<compile_context>
chip_gen: v7x
topology: tpu7x:2x2x1
jax: 0.10.0
libtpu: 0.0.40
codegen_flags: <defaults>
</compile_context>

<pallas_src>
import functools
import math

import jax
import jax.numpy as jnp
from jax.experimental import pallas as pl
from jax.experimental.pallas import tpu as pltpu


def _pe_kernel(inv_freq_ref, phase_ref, o_ref):
    """Writes one (tS, D) row-tile of the sinusoidal table.

    Even columns: sin(pos * w_k); odd columns: sin(pos * w_k + pi/2) == cos.
    One transcendental per element; column constants arrive as (1, D) inputs.
    """
    tS, _ = o_ref.shape
    # 1-based absolute row index of this tile (PyTorch: arange(1, S + 1)).
    base = pl.program_id(0) * tS + 1
    pos = (jax.lax.broadcasted_iota(jnp.int32, (tS, 1), 0) + base).astype(jnp.float32)
    angle = pos * inv_freq_ref[...] + phase_ref[...]          # (tS, D)
    o_ref[...] = jnp.sin(angle).astype(o_ref.dtype)


def _round_up(x: int, m: int) -> int:
    return -(-x // m) * m


def _row_tile(sent_len: int, d_embedding: int, itemsize: int,
              budget_bytes: int = 6 << 20) -> int:
    """8-aligned row tile: big enough to amortize per-step overhead, small
    enough that the double-buffered output block fits every generation's
    scoped-VMEM default, and small enough that the grid has >= 2 parallel
    steps for v7x megacore whenever sent_len allows it."""
    if sent_len <= 8:
        return sent_len                      # single full-extent block (legal)
    tile = (budget_bytes // (d_embedding * itemsize)) // 8 * 8
    tile = max(8, min(tile, 1024))           # row-tile sweet spot, VMEM-safe
    tile = min(tile, _round_up(pl.cdiv(sent_len, 2), 8))   # >= 2 grid steps
    tile = min(tile, _round_up(sent_len, 8))
    return tile


@functools.lru_cache(maxsize=None)
def position_encoding_table(sent_len: int, d_embedding: int, dtype=jnp.float32):
    """Builds the (sent_len, d_embedding) table once per shape (cached)."""
    out_dtype = jnp.dtype(dtype)
    tS = _row_tile(sent_len, d_embedding, out_dtype.itemsize)
    grid = (pl.cdiv(sent_len, tS),)

    # Column-only constants, hoisted out of the kernel's per-step body.
    d_idx = jnp.arange(d_embedding, dtype=jnp.int32)
    k = (d_idx // 2).astype(jnp.float32)
    inv_freq = jnp.exp(
        k * jnp.float32(-2.0 * math.log(10000.0) / d_embedding))[None, :]   # (1, D)
    phase = ((d_idx % 2).astype(jnp.float32)
             * jnp.float32(0.5 * math.pi))[None, :]                          # (1, D)

    pe = pl.pallas_call(
        _pe_kernel,
        out_shape=jax.ShapeDtypeStruct((sent_len, d_embedding), out_dtype),
        grid_spec=pltpu.PrefetchScalarGridSpec(
            num_scalar_prefetch=0,
            grid=grid,
            in_specs=[
                pl.BlockSpec((1, d_embedding), lambda i: (0, 0)),
                pl.BlockSpec((1, d_embedding), lambda i: (0, 0)),
            ],
            out_specs=pl.BlockSpec((tS, d_embedding), lambda i: (i, 0)),
        ),
        compiler_params=pltpu.CompilerParams(
            dimension_semantics=("parallel",),
        ),
    )(inv_freq, phase)
    return jax.block_until_ready(pe)


def position_encoder_forward(batch_size: int, sent_len: int, d_embedding: int,
                             dtype=jnp.float32):
    """Equivalent of PositionEncoder(d_embedding, sent_len).forward(batch_size).

    The batch 'repeat' is a broadcast of the cached constant table.  Consumers
    should prefer `position_encoding_table(...)` + broadcasted add to avoid
    materializing the (B, S, D) copy in HBM at all.
    """
    pe = position_encoding_table(sent_len, d_embedding, dtype)
    return jnp.broadcast_to(pe[None], (batch_size, sent_len, d_embedding))


def _reference(batch_size: int, sent_len: int, d_embedding: int):
    """Pure JAX reference mirroring the PyTorch buffer construction."""
    position = jnp.arange(1, sent_len + 1, dtype=jnp.float32)[:, None]
    div_term = jnp.exp(
        jnp.arange(0, d_embedding, 2, dtype=jnp.float32)
        * (-math.log(10000.0) / d_embedding))
    pe = jnp.zeros((sent_len, d_embedding), dtype=jnp.float32)
    pe = pe.at[:, 0::2].set(jnp.sin(position * div_term))
    if d_embedding % 2 == 0:
        pe = pe.at[:, 1::2].set(jnp.cos(position * div_term))
    else:
        pe = pe.at[:, 1::2].set(jnp.cos(position * div_term)[:, :-1])
    return jnp.broadcast_to(pe[None], (batch_size, sent_len, d_embedding))


if __name__ == "__main__":
    # Small shapes consistent with the module: seq=8, hidden=32, batch=2.
    batch_size, sent_len, d_embedding = 2, 8, 32

    # No learned parameters in this module; PRNGKey kept for convention only.
    _ = jax.random.PRNGKey(0)

    out = jax.block_until_ready(
        position_encoder_forward(batch_size, sent_len, d_embedding))
    ref = _reference(batch_size, sent_len, d_embedding)
    assert out.shape == (batch_size, sent_len, d_embedding)
    assert out.dtype == jnp.float32
    assert jnp.allclose(out, ref, atol=1e-5, rtol=1e-5)

    # Odd-d_embedding branch of the PyTorch code ("[:, :-1]") — same formula.
    out_odd = jax.block_until_ready(position_encoder_forward(1, 8, 33))
    assert jnp.allclose(out_odd, _reference(1, 8, 33), atol=1e-5, rtol=1e-5)

    # Non-multiple-of-8 sent_len — exercises the cdiv grid / masked last block.
    out_rag = jax.block_until_ready(position_encoder_forward(1, 20, 32))
    assert jnp.allclose(out_rag, _reference(1, 20, 32), atol=1e-5, rtol=1e-5)

    print("KERNEL_OK")
</pallas_src>

<mosaic_0001>
module attributes {stable_mosaic.version = 11 : i64} {
  func.func @_pe_kernel(%arg0: i32, %arg1: memref<1x32xf32, #tpu.memory_space<vmem>>, %arg2: memref<1x32xf32, #tpu.memory_space<vmem>>, %arg3: memref<8x32xf32, #tpu.memory_space<vmem>>) attributes {dimension_semantics = [#tpu.dimension_semantics<parallel>], iteration_bounds = array<i64: 1>, scalar_prefetch = 0 : i64, scratch_operands = 0 : i64, tpu.core_type = #tpu.core_type<tc>, window_params = [{pipeline_mode = #tpu.pipeline_mode<synchronous>, transform_indices = @transform_0, window_bounds = array<i64: 1, 32>}, {pipeline_mode = #tpu.pipeline_mode<synchronous>, transform_indices = @transform_1, window_bounds = array<i64: 1, 32>}, {transform_indices = @transform_2, window_bounds = array<i64: 8, 32>}]} {
    %c8_i32 = arith.constant 8 : i32
    %0 = arith.muli %arg0, %c8_i32 : i32
    %c1_i32 = arith.constant 1 : i32
    %1 = arith.addi %0, %c1_i32 : i32
    %2 = tpu.iota {dimensions = array<i32: 0>} : vector<8x1xi32>
    %3 = vector.broadcast %1 : i32 to vector<8x1xi32>
    %4 = arith.addi %2, %3 : vector<8x1xi32>
    %5 = arith.sitofp %4 : vector<8x1xi32> to vector<8x1xf32>
    %c0 = arith.constant 0 : index
    %c0_0 = arith.constant 0 : index
    %6 = vector.load %arg1[%c0, %c0_0] : memref<1x32xf32, #tpu.memory_space<vmem>>, vector<1x32xf32>
    %7 = vector.broadcast %5 : vector<8x1xf32> to vector<8x32xf32>
    %8 = vector.broadcast %6 : vector<1x32xf32> to vector<8x32xf32>
    %9 = arith.mulf %7, %8 : vector<8x32xf32>
    %c0_1 = arith.constant 0 : index
    %c0_2 = arith.constant 0 : index
    %10 = vector.load %arg2[%c0_1, %c0_2] : memref<1x32xf32, #tpu.memory_space<vmem>>, vector<1x32xf32>
    %11 = vector.broadcast %10 : vector<1x32xf32> to vector<8x32xf32>
    %12 = arith.addf %9, %11 : vector<8x32xf32>
    %13 = math.sin %12 : vector<8x32xf32>
    %c0_3 = arith.constant 0 : index
    %c0_4 = arith.constant 0 : index
    %14 = vector.load %arg3[%c0_3, %c0_4] : memref<8x32xf32, #tpu.memory_space<vmem>>, vector<8x32xf32>
    tpu.vector_store %arg3[%c0_3, %c0_4], %13 {strides = array<i32>} : memref<8x32xf32, #tpu.memory_space<vmem>>, vector<8x32xf32>,
    return
  }
  func.func @transform_0(%arg0: i32) -> (i32, i32) {
    %c0_i32 = arith.constant 0 : i32
    %c0_i32_0 = arith.constant 0 : i32
    %c0_i32_1 = arith.constant 0 : i32
    return %c0_i32, %c0_i32_0 : i32, i32
  }
  func.func @transform_1(%arg0: i32) -> (i32, i32) {
    %c0_i32 = arith.constant 0 : i32
    %c0_i32_0 = arith.constant 0 : i32
    %c0_i32_1 = arith.constant 0 : i32
    return %c0_i32, %c0_i32_0 : i32, i32
  }
  func.func @transform_2(%arg0: i32) -> (i32, i32) {
    %c0_i32 = arith.constant 0 : i32
    %c0_i32_0 = arith.constant 0 : i32
    return %arg0, %c0_i32 : i32, i32
  }
}

</mosaic_0001>

<bundles_post_ra>
// kernel: tpu_custom_call.1
= control target key start
LH: loop header
LB: loop body
LE: loop exit
PB: predicated region body
PF: predicated region fallthrough
CT: control target
= control target key end

     0   :  { %7 = vsyncpa [#allocation3], 0  ;;  %s309_s0 = inlined_call_operand.hbm [shape: f32[1,32], index: 0, kind: input, shape index: {}]   ;;  %s310_s1 = inlined_call_operand.vmem [shape: f32[1,32], index: 1, kind: input, shape index: {}]   ;;  %s311_s2 = inlined_call_operand.hbm [shape: f32[8,32], index: 2, kind: output, shape index: {}]  }
   0x1   :  { %8 = vsyncpa [#allocation4], 0  ;;  %s238_s9 = smov [#allocation2]   ;;  %s190_s13 = scalar_lea.hbm %s309_s0, 16 }
   0x2   :  { %s15_s10 = sshll.u32 %s238_s9, 4  ;;  %p191_p0 = scmp.ne.s32.totalorder %s309_s0, %s190_s13  ;;  %s16_s10 = int_to_ptr.vmem [resolvable:$true] %s15_s10 }
   0x3   :  { %p194_p1 = scmp.lt.u32.totalorder %s190_s13, %s309_s0 }
   0x5   :  { %p196_p2 = pnand %p194_p1, %p191_p0 }
   0x7   :  { %199 = shalt.err (!%p196_p2)
}
   0x8   :  { %s200_s18 = scalar_lea.vmem %s16_s10, 16  ;;  %s204_s19 = scalar_lea.vmem %s16_s10, 32 }
   0x9   :  { %p201_p3 = scmp.ne.s32.totalorder %s16_s10, %s200_s18  ;;  %p205_p4 = scmp.lt.s32.totalorder %s16_s10, %s16_s10 }
   0xa   :  { %p206_p5 = scmp.lt.s32.totalorder %s204_s19, %s200_s18 }
   0xc   :  { %p207_p6 = por %p206_p5, %p205_p4 }
   0xe   :  { %p208_p7 = pnand %p207_p6, %p201_p3 }
  0x10   :  { %211 = shalt.err (!%p208_p7)
}
  0x11   :  { %18 = dma.hbm_to_vmem [thread:$0]  %s309_s0, 16, %s16_s10, [#allocation3]  }
  0x12   :  { %234 = dma.done.wait [#allocation3], 16  }
  0x13   :  { %235 = vsyncadd [#allocation3], 4294967280  ;;  %v26_v0 = vlaneseq  ;;  %v168_v4 = vld [vmem:[#allocation2] ss:$0 sm:$0xff]  ;;  %v239_v19 = vmov 683565275  }
  0x14   :  { %v169_v5 = vld [vmem:[%s310_s1] ss:$0 sm:$0xff]  ;;  %v240_v21 = vmov 2475754826   ;;  %v241_v23 = vmov 2131351028  }
  0x15   :  { %v27_v1 = vshrl.u32 %v26_v0, 7  ;;  %v242_v25 = vmov 2102212464   ;;  %v243_v27 = vmov 920167782   ;;  %s245_s0 = smov [#allocation5]  }
  0x16   :  { %v244_v34 = vmov 1326507024   ;;  %s159_s1 = sshll.u32 %s245_s0, 4  ;;  %vm151_vm13 = vcmask 261120   ;;  %s160_s1 = int_to_ptr.vmem [resolvable:$true] %s159_s1 }
  0x17   :  { %v29_v2 = vadd.s32 1, %v27_v1  ;;  %s212_s24 = scalar_lea.vmem %s160_s1, 128  ;;  %p217_p9 = scmp.lt.s32.totalorder %s160_s1, %s160_s1 }
  0x18   :  { %p213_p8 = scmp.ne.s32.totalorder %s160_s1, %s212_s24  ;;  %p218_p10 = scmp.lt.s32.totalorder %s212_s24, %s212_s24 }
  0x19   :  { %v30_v3 = vcvt.s32.f32 %v29_v2 }
  0x1a   :  { %p219_p11 = por %p218_p10, %p217_p9 }
  0x1b   :  { %v38_v6 = vmul.f32 %v168_v4, %v30_v3 }
  0x1c   :  { %p220_p12 = pnand %p219_p11, %p213_p8 }
  0x1d   :  { %v276_v7 = vadd.f32 %v169_v5, %v38_v6 }
  0x1f   :  { %v50_v8 = vand.u32 2139095040, %v276_v7  ;;  %v47_v10 = vand.u32 2147483647, %v276_v7  ;;  %vm49_vm7 = vcmp.lt.s32.totalorder %v276_v7, 0  ;;  %vm139_vm12 = vweird.f32 %v276_v7 }
  0x21   :  { %v51_v9 = vshrl.u32 %v50_v8, 23  ;;  %v54_v13 = vand.u32 8388607, %v47_v10  ;;  %vm48_vm8 = vcmp.le.f32.partialorder %v47_v10, 0.7853982 }
  0x23   :  { %v170_v11 = vadd.s32 4294967169, %v51_v9  ;;  %v55_v16 = vor.u32 8388608, %v54_v13 }
  0x25   :  { %v57_v12 = vadd.s32 1, %v170_v11  ;;  %v95_v36 = vshll.u32 %v55_v16, 8 }
  0x27   :  { %vm58_vm0 = vcmp.gt.s32.totalorder %v57_v12, 0 }
  0x28   :  { %v59_v14 = vsel %vm58_vm0, %v57_v12, 0 }
  0x29   :  { %v61_v15 = vand.u32 31, %v59_v14  ;;  %v60_v17 = vshrl.u32 %v59_v14, 5 }
  0x2b   :  { %v62_v18 = vsub.s32 32, %v61_v15  ;;  %v64_v20 = vshll.u32 %v239_v19, %v61_v15  ;;  %v67_v22 = vshll.u32 %v240_v21, %v61_v15  ;;  %v70_v24 = vshll.u32 %v241_v23, %v61_v15 }
  0x2c   :  { %v73_v26 = vshll.u32 %v242_v25, %v61_v15  ;;  %v76_v28 = vshll.u32 %v243_v27, %v61_v15  ;;  %vm79_vm1 = vcmp.lt.s32.totalorder %v60_v17, 1  ;;  %vm82_vm2 = vcmp.lt.s32.totalorder %v60_v17, 4 }
  0x2d   :  { %v63_v29 = vshrl.u32 %v239_v19, %v62_v18  ;;  %v65_v30 = vshrl.u32 %v240_v21, %v62_v18  ;;  %v68_v31 = vshrl.u32 %v241_v23, %v62_v18  ;;  %v71_v32 = vshrl.u32 %v242_v25, %v62_v18 }
  0x2e   :  { %v74_v33 = vshrl.u32 %v243_v27, %v62_v18  ;;  %v77_v35 = vshrl.u32 %v244_v34, %v62_v18  ;;  %vm80_vm3 = vcmp.lt.s32.totalorder %v60_v17, 2  ;;  %vm81_vm4 = vcmp.lt.s32.totalorder %v60_v17, 3 }
  0x2f   :  { %v66_v37 = vor.u32 %v65_v30, %v64_v20  ;;  %v69_v38 = vor.u32 %v68_v31, %v67_v22  ;;  %v72_v39 = vor.u32 %v71_v32, %v70_v24 }
  0x30   :  { %v75_v40 = vor.u32 %v74_v33, %v73_v26  ;;  %v78_v41 = vor.u32 %v77_v35, %v76_v28 }
  0x31   :  { %v83_v42 = vsel %vm79_vm1, %v63_v29, %v66_v37  ;;  %v84_v43 = vsel %vm82_vm2, %v72_v39, 2102212464  ;;  %v87_v44 = vsel %vm79_vm1, %v66_v37, %v69_v38  ;;  %v91_v45 = vsel %vm79_vm1, %v69_v38, %v72_v39 }
  0x32   :  { %v85_v46 = vsel %vm81_vm4, %v69_v38, %v84_v43  ;;  %v88_v47 = vsel %vm82_vm2, %v75_v40, 920167782  ;;  %v92_v48 = vsel %vm82_vm2, %v78_v41, 1326507024 }
  0x33   :  { %v89_v49 = vsel %vm81_vm4, %v72_v39, %v88_v47  ;;  %v93_v50 = vsel %vm81_vm4, %v75_v40, %v92_v48  ;;  %v86_v51 = vsel %vm80_vm3, %v83_v42, %v85_v46 }
  0x34   :  { %v90_v52 = vsel %vm80_vm3, %v87_v44, %v89_v49  ;;  %v94_v53 = vsel %vm80_vm3, %v91_v45, %v93_v50  ;;  %v102_v58 = vmul.u32 %v95_v36, %v86_v51 }
  0x35   :  { %v282_v54 = vmul.u32.u64.low %v95_v36, %v94_v53  ;;  %v283_v55 = vmul.u32.u64.high %v95_v36, %v94_v53, %v282_v54  ;;  %v285_v56 = vmul.u32.u64.low %v95_v36, %v90_v52  ;;  %v286_v57 = vmul.u32.u64.high %v95_v36, %v90_v52, %v285_v56 }
  0x37   :  { %vm104_vm5 = vc.u32 %v283_v55, %v285_v56  ;;  %v105_v59 = vadd.s32 1, %v286_v57  ;;  %v103_v6 = vadd.s32 %v285_v56, %v283_v55 }
  0x39   :  { %v106_v60 = vsel %vm104_vm5, %v105_v59, %v286_v57 }
  0x3a   :  { %v107_v61 = vadd.s32 %v106_v60, %v102_v58 }
  0x3c   :  { %v108_v62 = vadd.s32 536870912, %v107_v61 }
  0x3e   :  { %v109_v63 = vshrl.u32 %v108_v62, 30 }
  0x40   :  { %v110_v0 = vshll.u32 %v109_v63, 30  ;;  %v133_v20 = vsub.s32 4, %v109_v63 }
  0x42   :  { %v111_v1 = vsub.s32 %v107_v61, %v110_v0  ;;  %v134_v23 = vsel %vm49_vm7, %v133_v20, %v109_v63 }
  0x43   :  { %v136_v26 = vsel %vm48_vm8, 0, %v134_v23 }
  0x44   :  { %v113_v2 = vsub.s32 0, %v111_v1  ;;  %v140_v27 = vadd.s32 3, %v136_v26 }
  0x46   :  { %v171_v3 = vmin.u32 %v113_v2, %v111_v1  ;;  %v141_v28 = vand.u32 3, %v140_v27 }
  0x48   :  { %v115_v4 = vclz %v171_v3  ;;  %vm146_vm9 = vcmp.eq.s32.totalorder %v141_v28, 2  ;;  %vm143_vm10 = vcmp.eq.s32.totalorder %v141_v28, 0  ;;  %vm142_vm11 = vcmp.lt.s32.totalorder %v141_v28, 2 }
  0x4a   :  { %v172_v5 = vadd.s32 4294967294, %v115_v4 }
  0x4c   :  { %vm173_vm6 = vcmp.lt.s32.totalorder %v172_v5, 0 }
  0x4d   :  { %v118_v8 = vsel %vm173_vm6, 0, %v172_v5 }
  0x4e   :  { %v119_v9 = vsub.s32 32, %v118_v8  ;;  %v120_v11 = vshll.u32 %v111_v1, %v118_v8  ;;  %v123_v12 = vsub.s32 4294967266, %v118_v8 }
  0x50   :  { %v121_v13 = vshrl.u32 %v103_v6, %v119_v9  ;;  %v124_v14 = vadd.s32 127, %v123_v12 }
  0x52   :  { %v122_v15 = vor.u32 %v121_v13, %v120_v11  ;;  %v125_v16 = vshll.u32 %v124_v14, 23 }
  0x54   :  { %v126_v17 = vor.u32 4788187, %v125_v16  ;;  %v129_v18 = vcvt.s32.f32 %v122_v15 }
  0x56   :  { %v127_v19 = vand.u32 2147483647, %v126_v17 }
  0x58   :  { %v130_v21 = vmul.f32 %v129_v18, %v127_v19 }
  0x5a   :  { %v131_v22 = vxor.u32 2147483648, %v130_v21 }
  0x5c   :  { %v132_v24 = vsel %vm49_vm7, %v131_v22, %v130_v21 }
  0x5d   :  { %v135_v25 = vsel %vm48_vm8, %v276_v7, %v132_v24 }
  0x5e   :  { %186 = vcosq.f32 %v135_v25 }
  0x5f   :  { %188 = vsinq.f32 %v135_v25 }
  0x68   :  { %v187_v29 = vpop.eup %186 }
  0x69   :  { %v189_v30 = vpop.eup %188  ;;  %v147_v31 = vxor.u32 2147483648, %v187_v29 }
  0x6a   :  { %v144_v32 = vxor.u32 2147483648, %v189_v30 }
  0x6b   :  { %v148_v10 = vsel %vm146_vm9, %v147_v31, %v189_v30 }
  0x6c   :  { %v145_v33 = vsel %vm143_vm10, %v187_v29, %v144_v32 }
  0x6d   :  { %v149_v34 = vsel %vm142_vm11, %v145_v33, %v148_v10 }
  0x6e   :  { %v150_v35 = vsel %vm139_vm12, nan, %v149_v34 }
  0x6f   :  { %152 = vst.msk [vmem:[#allocation5] sm:$0xff] %vm151_vm13, %v150_v35 }
  0x70   :  { %223 = shalt.err (!%p220_p12)
}
  0x71   :  { %s224_s27 = scalar_lea.hbm %s311_s2, 128 }
  0x72   :  { %p225_p13 = scmp.ne.s32.totalorder %s311_s2, %s224_s27  ;;  %p228_p0 = scmp.lt.u32.totalorder %s224_s27, %s311_s2 }
  0x74   :  { %p230_p1 = pnand %p228_p0, %p225_p13 }
  0x76   :  { %233 = shalt.err (!%p230_p1)
}
  0x77   :  { %162 = dma.vmem_to_hbm [thread:$0]  %s160_s1, 128, %s311_s2, [#allocation4]  }
  0x78   :  { %236 = dma.done.wait [#allocation4], 128  }
  0x79   :  { %237 = vsyncadd [#allocation4], 4294967168 }
  0x7a   :  { %166 = vsyncpa [#allocation3], 1 }
  0x7b   :  { %167 = vsyncpa [#allocation4], 1 }

</bundles_post_ra>
